<compile_context>
chip_gen: v5e
topology: v5e:2x2
jax: 0.10.0
libtpu: 0.0.40
codegen_flags: <defaults>
</compile_context>

<pallas_src>
import functools

import jax
import jax.numpy as jnp
from jax.experimental import pallas as pl
from jax.experimental.pallas import tpu as pltpu


def _round_up(v: int, m: int) -> int:
    return ((v + m - 1) // m) * m


_VMEM_BUDGET = 40 * 1024 * 1024   # keep tile footprint well under v7x's 64 MiB/TC
_VMEM_CAP = 48 * 1024 * 1024      # scoped-vmem cap, leaves headroom on v7x


# -----------------------------------------------------------------------------
# Kernels
# -----------------------------------------------------------------------------

def _silu_mul_fullk_kernel(x_ref, w1_ref, w2_ref, b1_ref, b2_ref, o_ref):
    """Full-K path: one shot per (i, j) output tile, no accumulator scratch."""
    x = x_ref[...]
    a = (jnp.dot(x, w1_ref[...], preferred_element_type=jnp.float32)
         + b1_ref[...].astype(jnp.float32))
    b = (jnp.dot(x, w2_ref[...], preferred_element_type=jnp.float32)
         + b2_ref[...].astype(jnp.float32))
    # SiLU(a) * b  (SiLU(a) = a * sigmoid(a))
    o_ref[...] = (a * jax.lax.logistic(a) * b).astype(o_ref.dtype)


def _silu_mul_ktiled_kernel(x_ref, w1_ref, w2_ref, b1_ref, b2_ref, o_ref,
                            acc1_ref, acc2_ref):
    """K-tiled path: two f32 accumulators, bias folded into init at k == 0."""
    k = pl.program_id(2)

    @pl.when(k == 0)
    def _():
        acc1_ref[...] = jnp.broadcast_to(
            b1_ref[...].astype(jnp.float32), acc1_ref.shape)
        acc2_ref[...] = jnp.broadcast_to(
            b2_ref[...].astype(jnp.float32), acc2_ref.shape)

    x = x_ref[...]
    acc1_ref[...] += jnp.dot(x, w1_ref[...], preferred_element_type=jnp.float32)
    acc2_ref[...] += jnp.dot(x, w2_ref[...], preferred_element_type=jnp.float32)

    @pl.when(k == pl.num_programs(2) - 1)
    def _():
        # Read each half directly from its ref (no wide load + value slice).
        a = acc1_ref[...]
        b = acc2_ref[...]
        o_ref[...] = (a * jax.lax.logistic(a) * b).astype(o_ref.dtype)


# -----------------------------------------------------------------------------
# Wrapper
# -----------------------------------------------------------------------------

def ipex_linear_silu_mul(x, w1, b1, w2, b2, *,
                         tm=512, tn=256, tk=1024,
                         compute_dtype=None, allow_fullk=True):
    """Fused SiLU(x @ W1 + b1) * (x @ W2 + b2) on TPU via Pallas.

    w1/w2 are (in_features, out_features); b1/b2 are (out_features,) or None.
    compute_dtype: optional dtype (e.g. jnp.bfloat16) to cast x/W1/W2 to for
    the MXU matmuls; accumulation is always f32 and the output keeps x.dtype.
    """
    orig_shape = x.shape
    out_dtype = x.dtype
    K = orig_shape[-1]
    x2 = x.reshape(-1, K)
    M = x2.shape[0]
    N = w1.shape[1]

    cdt = jnp.dtype(compute_dtype) if compute_dtype is not None else jnp.dtype(x.dtype)
    in_isz = cdt.itemsize
    out_isz = jnp.dtype(out_dtype).itemsize

    x2 = x2.astype(cdt)
    w1 = w1.astype(cdt)
    w2 = w2.astype(cdt)
    # Bias-less branches of the original module: substitute zeros. Biases are
    # kept in f32 (they are folded into the f32 accumulator anyway).
    b1 = jnp.zeros((N,), jnp.float32) if b1 is None else b1.reshape(N).astype(jnp.float32)
    b2 = jnp.zeros((N,), jnp.float32) if b2 is None else b2.reshape(N).astype(jnp.float32)

    # --- tile selection -------------------------------------------------------
    m_align = max(8, 32 // in_isz)            # 8 for f32, 16 for bf16
    tm = _round_up(max(m_align, min(tm, _round_up(M, m_align))), m_align)
    Mp = _round_up(M, tm)

    tn = _round_up(max(128, min(tn, _round_up(N, 128))), 128)
    # v7x has 2 TensorCores: if there is a single M block (decode), make sure
    # the N grid axis has >= 2 blocks so both cores get work.
    n128 = _round_up(N, 128)
    if Mp // tm == 1 and n128 >= 256:
        tn = min(tn, max(128, (n128 // 2) // 128 * 128))
    Np = _round_up(N, tn)

    Kp128 = _round_up(K, 128)

    def _fullk_vmem(tm_, tn_, kp_):
        return (2 * tm_ * kp_ * in_isz            # x (double buffered)
                + 2 * 2 * kp_ * tn_ * in_isz      # W1 + W2
                + 2 * 2 * tn_ * 4                 # biases (f32)
                + 2 * tm_ * tn_ * out_isz         # output
                + 3 * tm_ * tn_ * 4)              # f32 epilogue temporaries

    def _ktiled_vmem(tm_, tn_, tk_):
        return (2 * tm_ * tk_ * in_isz
                + 2 * 2 * tk_ * tn_ * in_isz
                + 2 * 2 * tn_ * 4
                + 2 * tm_ * tn_ * out_isz
                + 2 * tm_ * tn_ * 4               # two f32 accumulators
                + 3 * tm_ * tn_ * 4)              # epilogue temporaries

    use_fullk = allow_fullk and _fullk_vmem(tm, tn, Kp128) <= _VMEM_BUDGET

    if use_fullk:
        Kp = Kp128
        vmem_est = _fullk_vmem(tm, tn, Kp)
    else:
        tk = _round_up(max(128, min(tk, Kp128)), 128)
        while _ktiled_vmem(tm, tn, tk) > _VMEM_BUDGET and tk > 128:
            tk = max(128, _round_up(tk // 2, 128))
        while _ktiled_vmem(tm, tn, tk) > _VMEM_BUDGET and tm > m_align:
            tm = max(m_align, _round_up(tm // 2, m_align))
        Mp = _round_up(M, tm)
        Kp = _round_up(K, tk)
        vmem_est = _ktiled_vmem(tm, tn, tk)

    vmem_limit = int(min(max(vmem_est + vmem_est // 4 + (4 << 20), 16 << 20),
                         _VMEM_CAP))

    # --- zero-pad to tile multiples (padding in K contributes 0 to the dot) ---
    x_p = x2 if (Mp, Kp) == (M, K) else jnp.pad(x2, ((0, Mp - M), (0, Kp - K)))
    w1_p = w1 if (Kp, Np) == (K, N) else jnp.pad(w1, ((0, Kp - K), (0, Np - N)))
    w2_p = w2 if (Kp, Np) == (K, N) else jnp.pad(w2, ((0, Kp - K), (0, Np - N)))
    b1_p = (b1 if Np == N else jnp.pad(b1, (0, Np - N))).reshape(1, Np)
    b2_p = (b2 if Np == N else jnp.pad(b2, (0, Np - N))).reshape(1, Np)

    if use_fullk:
        grid = (Mp // tm, Np // tn)
        out = pl.pallas_call(
            _silu_mul_fullk_kernel,
            out_shape=jax.ShapeDtypeStruct((Mp, Np), out_dtype),
            grid_spec=pltpu.PrefetchScalarGridSpec(
                num_scalar_prefetch=0,
                grid=grid,
                in_specs=[
                    pl.BlockSpec((tm, Kp), lambda i, j: (i, 0)),   # x
                    pl.BlockSpec((Kp, tn), lambda i, j: (0, j)),   # W1
                    pl.BlockSpec((Kp, tn), lambda i, j: (0, j)),   # W2
                    pl.BlockSpec((1, tn), lambda i, j: (0, j)),    # b1
                    pl.BlockSpec((1, tn), lambda i, j: (0, j)),    # b2
                ],
                out_specs=pl.BlockSpec((tm, tn), lambda i, j: (i, j)),
            ),
            compiler_params=pltpu.CompilerParams(
                dimension_semantics=("parallel", "parallel"),
                vmem_limit_bytes=vmem_limit),
        )(x_p, w1_p, w2_p, b1_p, b2_p)
    else:
        grid = (Mp // tm, Np // tn, Kp // tk)
        out = pl.pallas_call(
            _silu_mul_ktiled_kernel,
            out_shape=jax.ShapeDtypeStruct((Mp, Np), out_dtype),
            grid_spec=pltpu.PrefetchScalarGridSpec(
                num_scalar_prefetch=0,
                grid=grid,
                in_specs=[
                    pl.BlockSpec((tm, tk), lambda i, j, k: (i, k)),   # x
                    pl.BlockSpec((tk, tn), lambda i, j, k: (k, j)),   # W1
                    pl.BlockSpec((tk, tn), lambda i, j, k: (k, j)),   # W2
                    pl.BlockSpec((1, tn), lambda i, j, k: (0, j)),    # b1
                    pl.BlockSpec((1, tn), lambda i, j, k: (0, j)),    # b2
                ],
                out_specs=pl.BlockSpec((tm, tn), lambda i, j, k: (i, j)),
                scratch_shapes=[pltpu.VMEM((tm, tn), jnp.float32),
                                pltpu.VMEM((tm, tn), jnp.float32)],
            ),
            compiler_params=pltpu.CompilerParams(
                dimension_semantics=("parallel", "parallel", "arbitrary"),
                vmem_limit_bytes=vmem_limit),
        )(x_p, w1_p, w2_p, b1_p, b2_p)

    if (Mp, Np) != (M, N):
        out = out[:M, :N]
    return out.reshape(*orig_shape[:-1], N)


# TODO(synk): tpp/woq flags of _IPEXlinearFusionXPU are metadata-only (no math);
# weight-only-quantized (woq) weights would need a dequant path not implemented here.


if __name__ == "__main__":
    key = jax.random.PRNGKey(0)
    k_x, k_w1, k_b1, k_w2, k_b2 = jax.random.split(key, 5)

    # --- Test 1: aligned shapes, both biases present (full-K path) ---
    batch, seq, hidden, inter = 2, 8, 128, 256
    x = jax.random.normal(k_x, (batch, seq, hidden), dtype=jnp.float32)
    # nn.Linear weights are (out, in); the module stores weight.T -> (in, out).
    w1 = jax.random.normal(k_w1, (hidden, inter), dtype=jnp.float32) * 0.05
    b1 = jax.random.normal(k_b1, (inter,), dtype=jnp.float32) * 0.05
    w2 = jax.random.normal(k_w2, (hidden, inter), dtype=jnp.float32) * 0.05
    b2 = jax.random.normal(k_b2, (inter,), dtype=jnp.float32) * 0.05

    out = jax.block_until_ready(ipex_linear_silu_mul(x, w1, b1, w2, b2))
    a = x @ w1 + b1
    b = x @ w2 + b2
    ref = (a * jax.nn.sigmoid(a)) * b
    assert out.shape == ref.shape
    assert jnp.allclose(out, ref, atol=1e-4, rtol=1e-4), \
        float(jnp.max(jnp.abs(out - ref)))

    # --- Test 2: ragged shapes (exercise padding) + missing bias on module 2 ---
    batch2, seq2, hidden2, inter2 = 1, 5, 96, 200
    kx2, kw1b, kw2b, kb1b = jax.random.split(k_x, 4)
    x2 = jax.random.normal(kx2, (batch2, seq2, hidden2), dtype=jnp.float32)
    w1b = jax.random.normal(kw1b, (hidden2, inter2), dtype=jnp.float32) * 0.05
    w2b = jax.random.normal(kw2b, (hidden2, inter2), dtype=jnp.float32) * 0.05
    b1b = jax.random.normal(kb1b, (inter2,), dtype=jnp.float32) * 0.05

    out2 = jax.block_until_ready(ipex_linear_silu_mul(x2, w1b, b1b, w2b, None))
    a2 = x2 @ w1b + b1b
    ref2 = (a2 * jax.nn.sigmoid(a2)) * (x2 @ w2b)
    assert out2.shape == ref2.shape
    assert jnp.allclose(out2, ref2, atol=1e-4, rtol=1e-4), \
        float(jnp.max(jnp.abs(out2 - ref2)))

    # --- Test 3: force the K-tiled accumulator path (multiple k steps) ---
    batch3, seq3, hidden3, inter3 = 1, 16, 512, 384
    kx3, kw13, kw23, kb13, kb23 = jax.random.split(k_b2, 5)
    x3 = jax.random.normal(kx3, (batch3, seq3, hidden3), dtype=jnp.float32)
    w13 = jax.random.normal(kw13, (hidden3, inter3), dtype=jnp.float32) * 0.05
    w23 = jax.random.normal(kw23, (hidden3, inter3), dtype=jnp.float32) * 0.05
    b13 = jax.random.normal(kb13, (inter3,), dtype=jnp.float32) * 0.05
    b23 = jax.random.normal(kb23, (inter3,), dtype=jnp.float32) * 0.05

    out3 = jax.block_until_ready(
        ipex_linear_silu_mul(x3, w13, b13, w23, b23,
                             tm=128, tn=128, tk=128, allow_fullk=False))
    a3 = x3 @ w13 + b13
    b3 = x3 @ w23 + b23
    ref3 = (a3 * jax.nn.sigmoid(a3)) * b3
    assert out3.shape == ref3.shape
    assert jnp.allclose(out3, ref3, atol=1e-4, rtol=1e-4), \
        float(jnp.max(jnp.abs(out3 - ref3)))

    # --- Test 4: bf16 compute path (f32 in/out, bf16 MXU, f32 accumulate) ---
    out4 = jax.block_until_ready(
        ipex_linear_silu_mul(x, w1, b1, w2, b2, compute_dtype=jnp.bfloat16))
    assert out4.shape == ref.shape
    assert jnp.allclose(out4, ref, atol=5e-2, rtol=5e-2), \
        float(jnp.max(jnp.abs(out4 - ref)))

    print("KERNEL_OK")
</pallas_src>

<mosaic_0001>
module attributes {stable_mosaic.version = 11 : i64} {
  func.func @_silu_mul_fullk_kernel(%arg0: i32, %arg1: i32, %arg2: memref<16x128xf32, #tpu.memory_space<vmem>>, %arg3: memref<128x128xf32, #tpu.memory_space<vmem>>, %arg4: memref<128x128xf32, #tpu.memory_space<vmem>>, %arg5: memref<1x128xf32, #tpu.memory_space<vmem>>, %arg6: memref<1x128xf32, #tpu.memory_space<vmem>>, %arg7: memref<16x128xf32, #tpu.memory_space<vmem>>) attributes {dimension_semantics = [#tpu.dimension_semantics<parallel>, #tpu.dimension_semantics<parallel>], iteration_bounds = array<i64: 1, 2>, scalar_prefetch = 0 : i64, scratch_operands = 0 : i64, tpu.core_type = #tpu.core_type<tc>, window_params = [{transform_indices = @transform_0, window_bounds = array<i64: 16, 128>}, {transform_indices = @transform_1, window_bounds = array<i64: 128, 128>}, {transform_indices = @transform_2, window_bounds = array<i64: 128, 128>}, {transform_indices = @transform_3, window_bounds = array<i64: 1, 128>}, {transform_indices = @transform_4, window_bounds = array<i64: 1, 128>}, {transform_indices = @transform_5, window_bounds = array<i64: 16, 128>}]} {
    %c0 = arith.constant 0 : index
    %c0_0 = arith.constant 0 : index
    %0 = vector.load %arg2[%c0, %c0_0] : memref<16x128xf32, #tpu.memory_space<vmem>>, vector<16x128xf32>
    %c0_1 = arith.constant 0 : index
    %c0_2 = arith.constant 0 : index
    %1 = vector.load %arg3[%c0_1, %c0_2] : memref<128x128xf32, #tpu.memory_space<vmem>>, vector<128x128xf32>
    %cst = arith.constant dense<0.000000e+00> : vector<16x128xf32>
    %2 = tpu.matmul %0, %1, %cst {dimension_numbers = #tpu.dot_dimension_numbers<[1], [0], [0], [1], [0, 0, 1, 1], [], []>} : vector<16x128xf32>, vector<128x128xf32>, vector<16x128xf32> -> vector<16x128xf32>
    %c0_3 = arith.constant 0 : index
    %c0_4 = arith.constant 0 : index
    %3 = vector.load %arg5[%c0_3, %c0_4] : memref<1x128xf32, #tpu.memory_space<vmem>>, vector<1x128xf32>
    %4 = vector.broadcast %3 : vector<1x128xf32> to vector<16x128xf32>
    %5 = arith.addf %2, %4 : vector<16x128xf32>
    %c0_5 = arith.constant 0 : index
    %c0_6 = arith.constant 0 : index
    %6 = vector.load %arg4[%c0_5, %c0_6] : memref<128x128xf32, #tpu.memory_space<vmem>>, vector<128x128xf32>
    %cst_7 = arith.constant dense<0.000000e+00> : vector<16x128xf32>
    %7 = tpu.matmul %0, %6, %cst_7 {dimension_numbers = #tpu.dot_dimension_numbers<[1], [0], [0], [1], [0, 0, 1, 1], [], []>} : vector<16x128xf32>, vector<128x128xf32>, vector<16x128xf32> -> vector<16x128xf32>
    %c0_8 = arith.constant 0 : index
    %c0_9 = arith.constant 0 : index
    %8 = vector.load %arg6[%c0_8, %c0_9] : memref<1x128xf32, #tpu.memory_space<vmem>>, vector<1x128xf32>
    %9 = vector.broadcast %8 : vector<1x128xf32> to vector<16x128xf32>
    %10 = arith.addf %7, %9 : vector<16x128xf32>
    %11 = arith.negf %5 : vector<16x128xf32>
    %12 = math.exp %11 : vector<16x128xf32>
    %cst_10 = arith.constant 1.000000e+00 : f32
    %13 = vector.broadcast %cst_10 : f32 to vector<16x128xf32>
    %14 = arith.addf %13, %12 : vector<16x128xf32>
    %15 = arith.divf %13, %14 : vector<16x128xf32>
    %16 = arith.mulf %5, %15 : vector<16x128xf32>
    %17 = arith.mulf %16, %10 : vector<16x128xf32>
    %c0_11 = arith.constant 0 : index
    %c0_12 = arith.constant 0 : index
    %18 = vector.load %arg7[%c0_11, %c0_12] : memref<16x128xf32, #tpu.memory_space<vmem>>, vector<16x128xf32>
    tpu.vector_store %arg7[%c0_11, %c0_12], %17 {strides = array<i32>} : memref<16x128xf32, #tpu.memory_space<vmem>>, vector<16x128xf32>,
    return
  }
  func.func @transform_0(%arg0: i32, %arg1: i32) -> (i32, i32) {
    %c0_i32 = arith.constant 0 : i32
    %c0_i32_0 = arith.constant 0 : i32
    return %arg0, %c0_i32 : i32, i32
  }
  func.func @transform_1(%arg0: i32, %arg1: i32) -> (i32, i32) {
    %c0_i32 = arith.constant 0 : i32
    %c0_i32_0 = arith.constant 0 : i32
    return %c0_i32, %arg1 : i32, i32
  }
  func.func @transform_2(%arg0: i32, %arg1: i32) -> (i32, i32) {
    %c0_i32 = arith.constant 0 : i32
    %c0_i32_0 = arith.constant 0 : i32
    return %c0_i32, %arg1 : i32, i32
  }
  func.func @transform_3(%arg0: i32, %arg1: i32) -> (i32, i32) {
    %c0_i32 = arith.constant 0 : i32
    %c0_i32_0 = arith.constant 0 : i32
    return %c0_i32, %arg1 : i32, i32
  }
  func.func @transform_4(%arg0: i32, %arg1: i32) -> (i32, i32) {
    %c0_i32 = arith.constant 0 : i32
    %c0_i32_0 = arith.constant 0 : i32
    return %c0_i32, %arg1 : i32, i32
  }
  func.func @transform_5(%arg0: i32, %arg1: i32) -> (i32, i32) {
    %c0_i32 = arith.constant 0 : i32
    return %arg0, %arg1 : i32, i32
  }
}

</mosaic_0001>

<bundles_post_ra>
// kernel: tpu_custom_call.1
= control target key start
LH: loop header
LB: loop body
LE: loop exit
PB: predicated region body
PF: predicated region fallthrough
CT: control target
= control target key end

     0   :  { %s1310_s0 = inlined_call_operand.hbm [shape: f32[16,128], index: 0, kind: input, shape index: {}]   ;;  %s1311_s1 = inlined_call_operand.hbm [shape: f32[128,256], index: 1, kind: input, shape index: {}]   ;;  %s1312_s2 = inlined_call_operand.hbm [shape: f32[128,256], index: 2, kind: input, shape index: {}]   ;;  %s1313_s3 = inlined_call_operand.vmem [shape: f32[1,256], index: 3, kind: input, shape index: {}]   ;;  %s1314_s4 = inlined_call_operand.hbm [shape: f32[1,256], index: 4, kind: input, shape index: {}]   ;;  %s1315_s5 = inlined_call_operand.hbm [shape: f32[16,256], index: 5, kind: output, shape index: {}]  }
   0x1   :  { %1318 = sst [smem:[#allocation17_spill]] %s1310_s0 }
   0x2   :  { %1319 = sst [smem:[#allocation18_spill]] %s1311_s1 }
   0x3   :  { %1320 = sst [smem:[#allocation19_spill]] %s1312_s2 }
   0x4   :  { %10 = vsyncpa [#allocation3], 0 }
   0x5   :  { %11 = vsyncpa [#allocation6], 0 }
   0x6   :  { %13 = vsyncpa [#allocation6 + $0x1], 0 }
   0x7   :  { %14 = vsyncpa [#allocation9], 0 }
   0x8   :  { %16 = vsyncpa [#allocation9 + $0x1], 0 }
   0x9   :  { %17 = vsyncpa [#allocation4], 0 }
   0xa   :  { %19 = vsyncpa [#allocation4 + $0x1], 0  ;;  %s1067_s18 = smov 0   ;;  %s1069_s19 = smov 0  }
   0xb   :  { %s1071_s20 = smov 0   ;;  %s1073_s21 = smov 0  }
   0xc   :  { %s1075_s22 = smov 0   ;;  %s1077_s23 = smov 0  }
   0xd LB: > { %s34_s24 = sadd.s32 1, %s1024_s22  ;;  %s70_s25 = sadd.s32 1, %s1016_s20  ;;  %s1028_s23 = sphi %s1077_s23, %s25_s23   ;;  %s1024_s22 = sphi %s1075_s22, %s1339_s22   ;;  %s1020_s21 = sphi %s1073_s21, %s1338_s21   ;;  %s1016_s20 = sphi %s1071_s20, %s1337_s20   ;;  %s1012_s19 = sphi %s1069_s19, %s1336_s19   ;;  %s1008_s18 = sphi %s1067_s18, %s1335_s18  }
   0xe   : > { %p35_p0 = scmp.ge.s32.totalorder %s34_s24, 2  ;;  %p77_p1 = scmp.ne.s32.totalorder %s1016_s20, %s1012_s19 }
   0xf   : > { %p78_p2 = scmp.eq.s32.totalorder %s1028_s23, 0  ;;  %p671_p4 = scmp.ge.s32.totalorder %s1028_s23, 2 }
  0x10   : > { %s1341_s24 = smov (%p35_p0, %s34_s24), 0  ;;  %p750_p6 = scmp.lt.s32.totalorder %s1028_s23, 2 }
  0x11   : > { %1321 = sst [smem:[#allocation15_spill]] %s1341_s24  ;;  %p1107_p3 = por %p78_p2, %p77_p1 }
  0x12   : > { %s67_s27 = ssub.s32 %s1024_s22, %s1341_s24  ;;  %s230_s28 = sand.u32 1, %s1028_s23  }
  0x13   : > { %p68_p5 = scmp.eq.s32.totalorder %s67_s27, 0  ;;  %s1117_s29 = sand.u32 1, %s1016_s20  }
  0x14   : > { %s672_s6 = sshll.u32 %s1117_s29, 7  ;;  %s673_s7 = sshll.u32 %s1024_s22, 3 }
  0x15   : > { %s1120_s30 = scalar_select %p68_p5, %s1016_s20, %s70_s25  }
  0x16   : > { %s1324_s1 = sld [smem:[#allocation18_spill]]  ;;  %s234_s11 = scalar_lea.vmem [#allocation5], %s672_s6 }
  0x17   : > { %1323 = sst [smem:[#allocation16_spill]] %s1120_s30  ;;  %s241_s12 = sshll.u32 %s234_s11, 4  ;;  %s242_s12 = int_to_ptr.vmem [resolvable:$true] %s241_s12 }
  0x18   : > { %p1129_p7 = pnand %p750_p6, %p1107_p3  ;;  %s1326_s2 = sld [smem:[#allocation19_spill]] }
  0x19   : > { %s1136_s25 = scalar_lea.sflag [#allocation6], %s230_s28  ;;  %s1316_s27 = smov 256  }
  0x1a   : > { %s1031_s8 = smov 128   ;;  %s1032_s9 = smov 8  }
  0x1b   : > { %s1145_s28 = sadd.s32 4294967295, %s1028_s23   ;;  %p83_p8 = scmp.ne.s32.totalorder %s1012_s19, %s1008_s18 }
  0x1c   : > { %s238_s10 = scalar_lea.hbm %s1324_s1, %s673_s7  ;;  %p84_p9 = scmp.eq.s32.totalorder %s1145_s28, 0 }
  0x1d   : > { %s239_s13 = sshll.u32 %s238_s10, 4  ;;  %s255_s10 = scalar_lea.vmem [#allocation7], %s672_s6  ;;  %s240_s13 = int_to_ptr.hbm [resolvable:$true] %s239_s13 }
  0x1e   : > { %s259_s17 = scalar_lea.hbm %s1326_s2, %s673_s7  ;;  %s262_s11 = sshll.u32 %s255_s10, 4  ;;  %s263_s11 = int_to_ptr.vmem [resolvable:$true] %s262_s11 }
  0x1f   : > { %738 = dma.hbm_to_vmem [thread:$0]  (!%p1129_p7), %s240_s13, 2048, %s242_s12, %s1136_s25, %s1316_s27, %s1031_s8, %s1032_s9  }
  0x20   : > { %s260_s26 = sshll.u32 %s259_s17, 4  ;;  %s668_s7 = sadd.s32 4294967294, %s1028_s23   ;;  %s261_s26 = int_to_ptr.hbm [resolvable:$true] %s260_s26 }
  0x21   : > { %p187_p10 = scmp.eq.s32.totalorder %s1145_s28, 1  ;;  %p193_p11 = scmp.eq.s32.totalorder %s668_s7, 1 }
  0x22   : > { %p1154_p12 = por %p84_p9, %p83_p8  ;;  %p669_p13 = scmp.ge.s32.totalorder %s1028_s23, 1 }
  0x23   : > { %p1162_p0 = por %p187_p10, %p77_p1  ;;  %p1166_p2 = por %p193_p11, %p83_p8 }
  0x24   : > { %p200_p3 = scmp.lt.s32.totalorder %s1028_s23, 3  ;;  %s1330_s0 = sld [smem:[#allocation17_spill]] }
  0x25   : > { %s1033_s7 = smov [#allocation2]   ;;  %s1332_s1 = smov 256  }
  0x26   : > { %p1174_p5 = pnand %p669_p13, %p200_p3  ;;  %s216_s27 = sshll.u32 %s1033_s7, 4  ;;  %s217_s27 = int_to_ptr.vmem [resolvable:$true] %s216_s27 }
  0x27   : > { %741 = dma.hbm_to_vmem [thread:$0]  (!%p1129_p7), %s261_s26, 2048, %s263_s11, %s1136_s25, %s1332_s1, %s1031_s8, %s1032_s9  }
  0x28   : > { %p731_p1 = pneg %p1174_p5  ;;  %s281_s2 = scalar_lea.vmem [#allocation8], %s1117_s29 }
  0x29   : > { %s288_s24 = sshll.u32 %s281_s2, 4  ;;  %s279_s7 = scalar_lea.sflag [#allocation9], %s1117_s29  ;;  %s289_s24 = int_to_ptr.vmem [resolvable:$true] %s288_s24 }
  0x2a   : > { %s214_s17 = sshll.u32 %s1330_s0, 4  ;;  %p732_p6 = pnand %p731_p1, %p84_p9  ;;  %s215_s17 = int_to_ptr.hbm [resolvable:$true] %s214_s17 }
  0x2b   : > { %s284_s0 = scalar_lea.hbm %s1314_s4, %s1024_s22  ;;  %297 = sbr.rel (%p1174_p5) target bundleno = 259 (0x103), region = 40 }
  0x2c   : > { %s286_s30 = sshll.u32 %s284_s0, 4  ;;  %s287_s30 = int_to_ptr.hbm [resolvable:$true] %s286_s30 }
  0x2d   : > { %734 = dma.hbm_to_vmem [thread:$0]  (!%p732_p6), %s215_s17, 256, %s217_s27, [#allocation3], %s1031_s8, %s1031_s8, %s1032_s9  }
  0x2e   : > { %744 = dma.hbm_to_vmem [thread:$0]  (!%p1129_p7), %s287_s30, 16, %s289_s24, %s279_s7  }
  0x30   : > { %991 = dma.done.wait (%p84_p9), [#allocation3], 256  }
  0x31   : > { %993 = vsyncadd (%p84_p9), [#allocation3], 4294967040  ;;  %s304_s0 = sand.u32 1, %s1145_s28   ;;  %s1207_s1 = sand.u32 1, %s1012_s19  }
  0x32   : > { %s678_s2 = sshll.u32 %s1207_s1, 7  ;;  %s305_s29 = scalar_lea.sflag [#allocation6], %s304_s0 }
  0x33   : > { %s1210_s14 = scalar_lea.vmem [#allocation5], %s678_s2 }
  0x34   : > { %995 = dma.done.wait (%p1154_p12), %s305_s29, 4096  }
  0x35   : > { %997 = vsyncadd (%p1154_p12), %s305_s29, 4294963200  ;;  %s1216_s24 = scalar_lea.vmem [#allocation7], %s678_s2  ;;  %s325_s30 = scalar_lea.sflag [#allocation9], %s1207_s1 }
  0x36   : > { %s327_s25 = scalar_lea.vmem [#allocation8], %s1207_s1 }
  0x37   : > { %999 = dma.done.wait (%p1154_p12), %s325_s30, 16  }
  0x38   : > { %1001 = vsyncadd (%p1154_p12), %s325_s30, 4294967280  ;;  %v389_v0 = vld [vmem:[%s1210_s14 + $0x78] sm:$0xff]  ;;  %v388_v1 = vld [vmem:[%s1210_s14 + $0x70] sm:$0xff]  ;;  %p368_p7 = scmp.lt.s32.totalorder %s1020_s21, 1  ;;  %s680_s6 = sshll.u32 %s1207_s1, 4 }
  0x39   : > { %394 = vmatpush.msra.mxu0 %v389_v0  ;;  %687 = vmatpush.msra.mxu2 %v389_v0  ;;  %v387_v2 = vld [vmem:[%s1210_s14 + $0x68] sm:$0xff]  ;;  %v386_v3 = vld [vmem:[%s1210_s14 + $0x60] sm:$0xff]  ;;  %v432_v4 = vld [vmem:[%s1216_s24 + $0x78] sm:$0xff]  ;;  %s684_s17 = sshll.u32 %s1020_s21, 3  ;;  %s366_s7 = scalar_lea.vmem [#allocation10], %s680_s6 }
  0x3a   : > { %v385_v5 = vld [vmem:[%s1210_s14 + $0x58] sm:$0xff]  ;;  %437 = vmatpush.msra.mxu1 %v432_v4  ;;  %703 = vmatpush.msra.mxu3 %v432_v4  ;;  %v431_v6 = vld [vmem:[%s1216_s24 + $0x70] sm:$0xff]  ;;  %s1233_s27 = scalar_select %p368_p7, %s1020_s21, 1  ;;  %v430_v7 = vld [vmem:[%s1216_s24 + $0x68] sm:$0xff] }
  0x3b   : > { %395 = vmatpush.msra.mxu0 %v388_v1  ;;  %688 = vmatpush.msra.mxu2 %v388_v1  ;;  %v384_v8 = vld [vmem:[%s1210_s14 + $0x50] sm:$0xff]  ;;  %v429_v9 = vld [vmem:[%s1216_s24 + $0x60] sm:$0xff]  ;;  %v383_v10 = vld [vmem:[%s1210_s14 + $0x48] sm:$0xff]  ;;  %s518_s16 = scalar_lea.hbm %s1315_s5, %s684_s17  ;;  %s519_s0 = sshll.u32 %s366_s7, 4  ;;  %s520_s0 = int_to_ptr.vmem [resolvable:$true] %s519_s0 }
  0x3c   : > { %438 = vmatpush.msra.mxu1 %v431_v6  ;;  %704 = vmatpush.msra.mxu3 %v431_v6  ;;  %s370_s26 = scalar_lea.vmem %s1313_s3, %s1233_s27  ;;  %v428_v11 = vld [vmem:[%s1216_s24 + $0x58] sm:$0xff]  ;;  %v382_v12 = vld [vmem:[%s1210_s14 + $0x40] sm:$0xff]  ;;  %v427_v13 = vld [vmem:[%s1216_s24 + $0x50] sm:$0xff]  ;;  %s521_s21 = sshll.u32 %s518_s16, 4  ;;  %s522_s21 = int_to_ptr.hbm [resolvable:$true] %s521_s21 }
  0x3d   : > { %396 = vmatpush.msra.mxu0 %v387_v2  ;;  %689 = vmatpush.msra.mxu2 %v387_v2  ;;  %v381_v14 = vld [vmem:[%s1210_s14 + $0x38] sm:$0xff]  ;;  %v426_v15 = vld [vmem:[%s1216_s24 + $0x48] sm:$0xff]  ;;  %v380_v16 = vld [vmem:[%s1210_s14 + $0x30] sm:$0xff]  ;;  %s505_s2 = scalar_lea.sflag [#allocation4], %s1207_s1  ;;  %s952_s29 = sshra.s32 %s522_s21, 4  ;;  %s953_s29 = int_to_ptr.hbm [resolvable:$true] %s952_s29 }
  0x3e   : > { %439 = vmatpush.msra.mxu1 %v430_v7  ;;  %705 = vmatpush.msra.mxu3 %v430_v7  ;;  %v425_v17 = vld [vmem:[%s1216_s24 + $0x40] sm:$0xff]  ;;  %v379_v18 = vld [vmem:[%s1210_s14 + $0x28] sm:$0xff]  ;;  %v424_v19 = vld [vmem:[%s1216_s24 + $0x38] sm:$0xff]  ;;  %p959_p11 = scmp.lt.s32.totalorder %s953_s29, %s1315_s5 }
  0x3f   : > { %397 = vmatpush.msra.mxu0 %v386_v3  ;;  %690 = vmatpush.msra.mxu2 %v386_v3  ;;  %v378_v20 = vld [vmem:[%s1210_s14 + $0x20] sm:$0xff]  ;;  %v423_v21 = vld [vmem:[%s1216_s24 + $0x30] sm:$0xff]  ;;  %v377_v22 = vld [vmem:[%s1210_s14 + $0x18] sm:$0xff] }
  0x40   : > { %440 = vmatpush.msra.mxu1 %v429_v9  ;;  %706 = vmatpush.msra.mxu3 %v429_v9  ;;  %v422_v23 = vld [vmem:[%s1216_s24 + $0x28] sm:$0xff]  ;;  %v376_v24 = vld [vmem:[%s1210_s14 + $0x10] sm:$0xff]  ;;  %v421_v25 = vld [vmem:[%s1216_s24 + $0x20] sm:$0xff] }
  0x41   : > { %398 = vmatpush.msra.mxu0 %v385_v5  ;;  %691 = vmatpush.msra.mxu2 %v385_v5  ;;  %v375_v26 = vld [vmem:[%s1210_s14 + $0x8] sm:$0xff]  ;;  %v420_v27 = vld [vmem:[%s1216_s24 + $0x18] sm:$0xff]  ;;  %v374_v28 = vld [vmem:[%s1210_s14] sm:$0xff]  ;;  %s954_s14 = scalar_lea.hbm %s953_s29, 16 }
  0x42   : > { %441 = vmatpush.msra.mxu1 %v428_v11  ;;  %707 = vmatpush.msra.mxu3 %v428_v11  ;;  %v372_v29 = vld [vmem:[#allocation2] sm:$0xff]  ;;  %v373_v30 = vld [vmem:[#allocation2 + $0x8] sm:$0xff]  ;;  %v418_v32 = vld [vmem:[%s1216_s24 + $0x8] sm:$0xff]  ;;  %p955_p8 = scmp.ne.s32.totalorder %s953_s29, %s954_s14 }
  0x43   : > { %399 = vmatpush.msra.mxu0 %v384_v8  ;;  %692 = vmatpush.msra.mxu2 %v384_v8  ;;  %v419_v31 = vld [vmem:[%s1216_s24 + $0x10] sm:$0xff]  ;;  %v417_v33 = vld [vmem:[%s1216_s24] sm:$0xff] }
  0x44   : > { %442 = vmatpush.msra.mxu1 %v427_v13  ;;  %708 = vmatpush.msra.mxu3 %v427_v13  ;;  %v808_v34 = vld [vmem:[%s370_s26] ss:$0 sm:$0xff]  ;;  %p956_p9 = pnand %p955_p8, %p1162_p0 }
  0x45   : > { %400 = vmatpush.msra.mxu0 %v383_v10  ;;  %693 = vmatpush.msra.mxu2 %v383_v10  ;;  %v809_v51 = vld [vmem:[%s327_s25] ss:$0 sm:$0xff]  ;;  %s958_s25 = scalar_lea.hbm %s1315_s5, 32 }
  0x46   : > { %443 = vmatpush.msra.mxu1 %v426_v15  ;;  %709 = vmatpush.msra.mxu3 %v426_v15  ;;  %p957_p10 = pneg %p956_p9  ;;  %p960_p12 = scmp.lt.s32.totalorder %s958_s25, %s954_s14 }
  0x47   : > { %401 = vmatpush.msra.mxu0 %v382_v12  ;;  %694 = vmatpush.msra.mxu2 %v382_v12 }
  0x48   : > { %444 = vmatpush.msra.mxu1 %v425_v17  ;;  %710 = vmatpush.msra.mxu3 %v425_v17  ;;  %p961_p13 = por %p960_p12, %p959_p11 }
  0x49   : > { %402 = vmatpush.msra.mxu0 %v381_v14  ;;  %695 = vmatpush.msra.mxu2 %v381_v14 }
  0x4a   : > { %445 = vmatpush.msra.mxu1 %v424_v19  ;;  %711 = vmatpush.msra.mxu3 %v424_v19  ;;  %p962_p3 = pnand %p961_p13, %p957_p10 }
  0x4b   : > { %403 = vmatpush.msra.mxu0 %v380_v16  ;;  %696 = vmatpush.msra.mxu2 %v380_v16 }
  0x4c   : > { %446 = vmatpush.msra.mxu1 %v423_v21  ;;  %712 = vmatpush.msra.mxu3 %v423_v21 }
  0x4d   : > { %404 = vmatpush.msra.mxu0 %v379_v18  ;;  %697 = vmatpush.msra.mxu2 %v379_v18 }
  0x4e   : > { %447 = vmatpush.msra.mxu1 %v422_v23  ;;  %713 = vmatpush.msra.mxu3 %v422_v23 }
  0x4f   : > { %405 = vmatpush.msra.mxu0 %v378_v20  ;;  %698 = vmatpush.msra.mxu2 %v378_v20 }
  0x50   : > { %448 = vmatpush.msra.mxu1 %v421_v25  ;;  %714 = vmatpush.msra.mxu3 %v421_v25 }
  0x51   : > { %406 = vmatpush.msra.mxu0 %v377_v22  ;;  %699 = vmatpush.msra.mxu2 %v377_v22 }
  0x52   : > { %449 = vmatpush.msra.mxu1 %v420_v27  ;;  %715 = vmatpush.msra.mxu3 %v420_v27 }
  0x53   : > { %407 = vmatpush.msra.mxu0 %v376_v24  ;;  %700 = vmatpush.msra.mxu2 %v376_v24 }
  0x54   : > { %450 = vmatpush.msra.mxu1 %v419_v31  ;;  %716 = vmatpush.msra.mxu3 %v419_v31 }
  0x55   : > { %408 = vmatpush.msra.mxu0 %v375_v26  ;;  %701 = vmatpush.msra.mxu2 %v375_v26 }
  0x56   : > { %451 = vmatpush.msra.mxu1 %v418_v32  ;;  %717 = vmatpush.msra.mxu3 %v418_v32 }
  0x57   : > { %409 = vmatpush.msra.mxu0 %v374_v28  ;;  %702 = vmatpush.msra.mxu2 %v374_v28 }
  0x58   : > { %410 = vmatmul.f32.vlgmr.msra.gmra.mxu0 %v372_v29  ;;  %413 = vmatmul.f32.vlgmr.msra.gmra.mxu2 %v373_v30 }
  0x59   : > { %452 = vmatpush.msra.mxu1 %v417_v33  ;;  %718 = vmatpush.msra.mxu3 %v417_v33 }
  0x5a   : > { %453 = vmatmul.f32.vlgmr.msra.gmra.mxu1 %v372_v29  ;;  %456 = vmatmul.f32.vlgmr.msra.gmra.mxu3 %v373_v30 }
  0xd5   : > { %v411_v35 = vpop.f32.mrf.mxu0 }
  0xd6   : > { %v412_v36 = vadd.f32 %v808_v34, %v411_v35 }
  0xd7   : > { %v454_v53 = vpop.f32.mrf.mxu1 }
  0xd8   : > { %v681_v37 = vmul.f32 -1.442695, %v412_v36  ;;  %v455_v59 = vadd.f32 %v809_v51, %v454_v53 }
  0xda   : > { %810 = vpow2.f32 %v681_v37 }
  0xdb   : > { %v414_v38 = vpop.f32.mrf.mxu2 }
  0xdc   : > { %v415_v39 = vadd.f32 %v808_v34, %v414_v38 }
  0xdd   : > { %v457_v1 = vpop.f32.mrf.mxu3 }
  0xde   : > { %v682_v40 = vmul.f32 -1.442695, %v415_v39  ;;  %v458_v6 = vadd.f32 %v809_v51, %v457_v1 }
  0xe0   : > { %v811_v41 = vpop.eup %810  ;;  %812 = vpow2.f32 %v682_v40 }
  0xe1   : > { %v466_v42 = vadd.f32 1.0, %v811_v41 }
  0xe3   : > { %814 = vrcp.f32 %v466_v42  ;;  %v479_v48 = vand.u32 2147483648, %v466_v42  ;;  %vm473_vm0 = vweird.f32 %v466_v42  ;;  %v477_v50 = vand.u32 2147483647, %v466_v42 }
  0xe5   : > { %v480_v56 = vor.u32 1.1754944e-38, %v479_v48  ;;  %vm478_vm3 = vcmp.eq.f32.partialorder %v477_v50, 8.507059e+37 }
  0xe6   : > { %v813_v43 = vpop.eup %812 }
  0xe7   : > { %v467_v44 = vadd.f32 1.0, %v813_v43 }
  0xe9   : > { %v815_v45 = vpop.eup %814  ;;  %816 = vrcp.f32 %v467_v44  ;;  %v494_v61 = vand.u32 2147483648, %v467_v44  ;;  %v492_v0 = vand.u32 2147483647, %v467_v44  ;;  %vm488_vm5 = vweird.f32 %v467_v44 }
  0xea   : > { %v469_v46 = vmul.f32 %v815_v45, %v466_v42  ;;  %vm474_vm1 = vweird.f32 %v815_v45 }
  0xeb   : > { %vm475_vm2 = vmor %vm473_vm0, %vm474_vm1  ;;  %v495_v4 = vor.u32 1.1754944e-38, %v494_v61  ;;  %vm493_vm7 = vcmp.eq.f32.partialorder %v492_v0, 8.507059e+37 }
  0xec   : > { %v470_v47 = vsub.f32 1.0, %v469_v46 }
  0xee   : > { %v471_v49 = vmul.f32 %v815_v45, %v470_v47 }
  0xef   : > { %v817_v52 = vpop.eup %816 }
  0xf0   : > { %v472_v54 = vadd.f32 %v815_v45, %v471_v49  ;;  %v484_v55 = vmul.f32 %v817_v52, %v467_v44  ;;  %vm489_vm4 = vweird.f32 %v817_v52 }
  0xf1   : > { %vm490_vm6 = vmor %vm488_vm5, %vm489_vm4 }
  0xf2   : > { %v476_v57 = vsel %vm475_vm2, %v815_v45, %v472_v54  ;;  %v485_v58 = vsub.f32 1.0, %v484_v55 }
  0xf3   : > { %v481_v60 = vsel %vm478_vm3, %v480_v56, %v476_v57 }
  0xf4   : > { %v498_v62 = vmul.f32 %v481_v60, %v412_v36  ;;  %v486_v63 = vmul.f32 %v817_v52, %v485_v58 }
  0xf6   : > { %v487_v2 = vadd.f32 %v817_v52, %v486_v63  ;;  %v500_v3 = vmul.f32 %v498_v62, %v455_v59 }
  0xf8   : > { %v491_v5 = vsel %vm490_vm6, %v817_v52, %v487_v2  ;;  %502 = vst [vmem:[%s366_s7] sm:$0xff] %v500_v3 }
  0xf9   : > { %v496_v7 = vsel %vm493_vm7, %v495_v4, %v491_v5 }
  0xfa   : > { %v499_v8 = vmul.f32 %v496_v7, %v415_v39 }
  0xfc   : > { %v501_v9 = vmul.f32 %v499_v8, %v458_v6 }
  0xfe   : > { %503 = vst [vmem:[%s366_s7 + $0x8] sm:$0xff] %v501_v9 }
  0xff   : > { %965 = shalt.err (!%p962_p3)
}
 0x100   : > { %s1034_s1 = smov 128   ;;  %s1035_s9 = smov 256  }
 0x101   : > { %s1036_s26 = smov 8  }
 0x102   : > { %729 = dma.vmem_to_hbm [thread:$0]  (%p1162_p0), %s520_s0, 256, %s522_s21, %s505_s2, %s1034_s1, %s1035_s9, %s1036_s26  }
 0x103 PF: > { %s536_s11 = sand.u32 1, %s1008_s18   ;;  %p746_p5 = pnand %p671_p4, %p1166_p2 }
 0x104   : > { %s537_s28 = scalar_lea.sflag [#allocation4], %s536_s11 }
 0x105   : > { %p747_p1 = pneg %p746_p5 }
 0x107   : > { %1003 = dma.done.wait (%p747_p1), %s537_s28, 256  }
 0x108   : > { %1005 = vsyncadd (%p747_p1), %s537_s28, 4294967040  ;;  %s25_s23 = sadd.s32 1, %s1028_s23   ;;  %s1333_s6 = sld [smem:[#allocation16_spill]] }
 0x109   : > { %p22_p6 = scmp.ge.s32.totalorder %s25_s23, 4   ;;  %s1334_s12 = sld [smem:[#allocation15_spill]] }
 0x10a   : > { %s1335_s18 = smov %s1012_s19  ;;  %s1336_s19 = smov %s1016_s20 }
 0x10b   : > { %s1338_s21 = smov %s1024_s22  ;;  %24 = sbr.rel (!%p22_p6) target bundleno = 13 (0xd), region = 118 }
 0x10e   : > { %s1337_s20 = smov %s1333_s6 }
 0x10f   : > { %s1339_s22 = smov %s1334_s12 }
 0x110   :  { %543 = vsyncpa [#allocation3], 1 }
 0x111   :  { %545 = vsyncpa [#allocation3 + $0x1], 1 }
 0x112   :  { %546 = vsyncpa [#allocation6], 1 }
 0x113   :  { %548 = vsyncpa [#allocation6 + $0x1], 1 }
 0x114   :  { %549 = vsyncpa [#allocation9], 1 }
 0x115   :  { %551 = vsyncpa [#allocation9 + $0x1], 1 }
 0x116   :  { %552 = vsyncpa [#allocation4], 1 }
 0x117   :  { %554 = vsyncpa [#allocation4 + $0x1], 1 }

</bundles_post_ra>
